<compile_context>
chip_gen: v6e
topology: v6e:2x2x1
jax: 0.10.0
libtpu: 0.0.40
codegen_flags: <defaults>
</compile_context>

<pallas_src>
import jax
import jax.numpy as jnp
from jax import lax
from jax.experimental import pallas as pl
from jax.experimental.pallas import tpu as pltpu


_BLOCK = 8                  # sublane-aligned store granularity (f32 vreg rows)
_STATIC_UNROLL_MAX = 256    # fully unroll the time loop up to this many padded steps
_FORI_UNROLL_BLOCKS = 4     # 4 blocks * 8 steps = 32 steps per fori body


def _make_kernel(Np, x_size, hidden):
    """Build the RNNLFR kernel for static padded length Np and state size x_size."""
    n_blocks = Np // _BLOCK

    def kernel(scal_ref, u_ref, a_ref, wfc1_ref, bu_ref, bw_ref, dzufc1_ref,
               fc1b_ref, fc2w_ref, y_ref, ucomb_scr, ufc1_scr):
        # ---- scalar weights (SMEM), read once -------------------------------
        dyu = scal_ref[0]                       # Dyu[0, 0]
        dyw = scal_ref[1]                       # Dyw[0, 0]
        fc2b = scal_ref[2]                      # fc2 bias (w_size == 1)
        cy = [scal_ref[3 + i] for i in range(x_size)]   # Cy[i, 0]

        # ---- small dense weights: load + pre-slice rows ONCE (hoisted) ------
        a_rows = [a_ref[i:i + 1, :] for i in range(x_size)]        # (1, x_size) each
        wf1_rows = [wfc1_ref[i:i + 1, :] for i in range(x_size)]   # (1, hidden) each
        bw = bw_ref[...]                        # (1, x_size)   Bw
        fc2w = fc2w_ref[...]                    # (1, hidden)   fc2 weight (transposed)

        # ---- time-parallel precompute of all u-dependent terms (off-chain) --
        u_all = u_ref[...]                                          # (Np, 1)
        ucomb_scr[...] = u_all * bu_ref[...]                        # u @ Bu        (Np, x_size)
        ufc1_scr[...] = u_all * dzufc1_ref[...] + fc1b_ref[...]     # u*Dzu*fc1w+b1 (Np, hidden)

        # ---- serial recurrence: only x -> h -> w -> x on the chain ----------
        def block(blk, x):
            t0 = blk * _BLOCK
            if not isinstance(blk, int):
                t0 = pl.multiple_of(t0, _BLOCK)
            ua_blk = ucomb_scr[pl.ds(t0, _BLOCK), :]     # (8, x_size)
            uf1_blk = ufc1_scr[pl.ds(t0, _BLOCK), :]     # (8, hidden)

            xs, ws = [], []
            for s in range(_BLOCK):
                xs.append(x)
                xi = [x[:, i:i + 1] for i in range(x_size)]   # shared lane-broadcasts
                p = uf1_blk[s:s + 1, :]                       # (1, hidden)
                xa = ua_blk[s:s + 1, :]                       # (1, x_size)
                for i in range(x_size):
                    p = p + xi[i] * wf1_rows[i]               # (x@Cz + u@Dzu)*fc1w + b1
                    xa = xa + xi[i] * a_rows[i]               # x@A + u@Bu
                h = jnp.maximum(p, 0.0)                       # ReLU          (1, hidden)
                w = jnp.sum(h * fc2w, axis=-1, keepdims=True) + fc2b   # fc2  (1, 1)
                ws.append(w)
                x = xa + w * bw                               # x_{t+1}

            # --- off-chain: assemble this block's y and store once ----------
            xcat = jnp.concatenate(xs, axis=0)                # (8, x_size)
            wcat = jnp.concatenate(ws, axis=0)                # (8, 1)
            ublk = u_ref[pl.ds(t0, _BLOCK), :]                # (8, 1)
            yblk = ublk * dyu + wcat * dyw
            for i in range(x_size):
                yblk = yblk + xcat[:, i:i + 1] * cy[i]        # + x@Cy
            y_ref[pl.ds(t0, _BLOCK), :] = yblk                # one aligned store / 8 steps
            return x

        x0 = jnp.zeros((1, x_size), jnp.float32)
        if Np <= _STATIC_UNROLL_MAX:
            x = x0
            for blk in range(n_blocks):                       # full static unroll
                x = block(blk, x)
        else:
            x = lax.fori_loop(0, n_blocks, block, x0,
                              unroll=_FORI_UNROLL_BLOCKS)     # 32 steps / body
        del x  # final state is not an output of the module

    return kernel


def rnn_lfr_forward(params, inp):
    """Forward pass of RNNLFR; inp is a 1-D array of length N.  Returns (N,)."""
    N = int(inp.shape[0])
    x_size = params["A"].shape[0]
    hidden = params["fc1w"].shape[1]
    # This kernel specializes the module defaults u_size = y_size = w_size = z_size = 1.
    assert params["Dzu"].shape == (1, 1)
    assert params["Dyu"].shape == (1, 1)
    assert params["Dyw"].shape == (1, 1)
    assert params["Cy"].shape == (x_size, 1)
    assert params["Cz"].shape == (x_size, 1)
    assert params["Bu"].shape == (1, x_size)
    assert params["Bw"].shape == (1, x_size)
    assert params["fc1w"].shape == (1, hidden)
    assert params["fc2w"].shape == (hidden, 1)

    # Pad the time axis to a sublane multiple; the recurrence is causal, so the
    # extra (zero-input) steps only feed y[N:Np], which the wrapper discards.
    Np = max(_BLOCK, -(-N // _BLOCK) * _BLOCK)
    u = jnp.zeros((Np, 1), jnp.float32).at[:N, 0].set(inp.astype(jnp.float32))

    # Tiny one-time weight preprocessing (fold the scalar z path into the state MADs).
    wfc1 = (params["Cz"] @ params["fc1w"]).astype(jnp.float32)     # (x_size, hidden)
    dzufc1 = (params["Dzu"] @ params["fc1w"]).astype(jnp.float32)  # (1, hidden)
    scal = jnp.concatenate([
        params["Dyu"].reshape(-1), params["Dyw"].reshape(-1),
        params["fc2b"].reshape(-1), params["Cy"].reshape(-1),
    ]).astype(jnp.float32)                                         # (3 + x_size,)

    vmem = pl.BlockSpec(memory_space=pltpu.MemorySpace.VMEM)
    smem = pl.BlockSpec(memory_space=pltpu.MemorySpace.SMEM)

    # Resident VMEM: u + y + ucomb + ufc1 (+ tiny weights); bound it explicitly.
    resident = 4 * Np * (2 + x_size + hidden)
    vmem_limit = min(64 << 20, resident + (4 << 20))
    # TODO(synk): for very long sequences (resident approaching the v7x/v5e VMEM
    # budget) switch to a 1-D 'arbitrary' time-chunk grid with the state carried
    # in scratch so u streams in / y streams out via BlockSpec pipelining.

    y = pl.pallas_call(
        _make_kernel(Np, x_size, hidden),
        out_shape=jax.ShapeDtypeStruct((Np, 1), jnp.float32),
        in_specs=[smem] + [vmem] * 8,
        out_specs=vmem,
        scratch_shapes=[
            pltpu.VMEM((Np, x_size), jnp.float32),   # u @ Bu precompute
            pltpu.VMEM((Np, hidden), jnp.float32),   # u*Dzu*fc1w + fc1b precompute
        ],
        compiler_params=pltpu.CompilerParams(vmem_limit_bytes=vmem_limit),
    )(scal, u, params["A"].astype(jnp.float32), wfc1,
      params["Bu"].astype(jnp.float32), params["Bw"].astype(jnp.float32),
      dzufc1, params["fc1b"].astype(jnp.float32),
      params["fc2w"].T.astype(jnp.float32))
    # torch.stack of per-step y.squeeze() scalars -> shape (N,)
    return y[:N, 0]
    # TODO(synk): if batches of independent sequences are ever available, carry a
    # (B, x_size) state / (B, hidden) activation so B sequences advance per step
    # in the same vregs, and add a leading 'parallel' grid axis for v7x's 2nd TC.


def init_params(key, hidden_size=32, x_size=2, u_size=1, y_size=1,
                w_size=1, z_size=1):
    """Deterministic synthetic parameters (PyTorch-Linear-like uniform init).

    Weights are stored transposed: shape (in_features, out_features)."""
    keys = jax.random.split(key, 12)

    def lin(k, in_f, out_f):
        bound = float(in_f) ** -0.5
        return jax.random.uniform(k, (in_f, out_f), jnp.float32, -bound, bound)

    params = {
        "A":    lin(keys[0], x_size, x_size),
        "Bu":   lin(keys[1], u_size, x_size),
        "Bw":   lin(keys[2], w_size, x_size),
        "Cy":   lin(keys[3], x_size, y_size),
        "Dyu":  lin(keys[4], u_size, y_size),
        "Dyw":  lin(keys[5], w_size, y_size),
        "Cz":   lin(keys[6], x_size, z_size),
        "Dzu":  lin(keys[7], u_size, z_size),
        # NOTE: the module also defines Dzw, but forward() never uses it.
        "fc1w": lin(keys[8], z_size, hidden_size),
        "fc1b": 0.1 * jax.random.uniform(keys[9], (1, hidden_size),
                                         jnp.float32, -1.0, 1.0),
        "fc2w": lin(keys[10], hidden_size, w_size),
        "fc2b": 0.1 * jax.random.uniform(keys[11], (1, w_size),
                                         jnp.float32, -1.0, 1.0),
    }
    return params


def rnn_lfr_reference(params, inp):
    """Pure-JAX reference of the exact PyTorch forward semantics."""
    N = inp.shape[0]
    u_seq = inp.reshape(N, 1).astype(jnp.float32)

    def step(x, u):
        u = u.reshape(1, -1)
        z = x @ params["Cz"] + u @ params["Dzu"]
        h = jnp.maximum(z @ params["fc1w"] + params["fc1b"], 0.0)
        w = h @ params["fc2w"] + params["fc2b"]
        y = x @ params["Cy"] + u @ params["Dyu"] + w @ params["Dyw"]
        x_new = x @ params["A"] + u @ params["Bu"] + w @ params["Bw"]
        return x_new, y[0, 0]

    x0 = jnp.zeros((1, params["A"].shape[0]), jnp.float32)
    _, ys = jax.lax.scan(step, x0, u_seq)
    return ys


if __name__ == "__main__":
    key = jax.random.PRNGKey(0)
    pkey, ikey = jax.random.split(key)

    hidden_size = 32
    params = init_params(pkey, hidden_size=hidden_size)

    # Primary small case plus two extra lengths (non-multiple-of-8 padding and
    # multi-block recurrence) to exercise the block stash / store path.
    ok = True
    for N in (8, 13, 40):
        inp = jax.random.normal(jax.random.fold_in(ikey, N), (N,), jnp.float32)
        y = jax.block_until_ready(rnn_lfr_forward(params, inp))
        y_ref = rnn_lfr_reference(params, inp)
        assert y.shape == (N,), y.shape
        ok = ok and bool(jnp.allclose(y, y_ref, atol=1e-5, rtol=1e-4))
        assert ok, (N, y, y_ref)

    print("KERNEL_OK")
</pallas_src>

<mosaic_0001>
module attributes {stable_mosaic.version = 11 : i64} {
  func.func @kernel(%arg0: memref<5xf32, #tpu.memory_space<smem>>, %arg1: memref<8x1xf32, #tpu.memory_space<vmem>>, %arg2: memref<2x2xf32, #tpu.memory_space<vmem>>, %arg3: memref<2x32xf32, #tpu.memory_space<vmem>>, %arg4: memref<1x2xf32, #tpu.memory_space<vmem>>, %arg5: memref<1x2xf32, #tpu.memory_space<vmem>>, %arg6: memref<1x32xf32, #tpu.memory_space<vmem>>, %arg7: memref<1x32xf32, #tpu.memory_space<vmem>>, %arg8: memref<1x32xf32, #tpu.memory_space<vmem>>, %arg9: memref<8x1xf32, #tpu.memory_space<vmem>>, %arg10: memref<8x2xf32, #tpu.memory_space<vmem>>, %arg11: memref<8x32xf32, #tpu.memory_space<vmem>>) attributes {dimension_semantics = [], scalar_prefetch = 0 : i64, scratch_operands = 2 : i64, tpu.core_type = #tpu.core_type<tc>} {
    %c0 = arith.constant 0 : index
    %0 = memref.load %arg0[%c0] : memref<5xf32, #tpu.memory_space<smem>>
    %c1 = arith.constant 1 : index
    %1 = memref.load %arg0[%c1] : memref<5xf32, #tpu.memory_space<smem>>
    %c2 = arith.constant 2 : index
    %2 = memref.load %arg0[%c2] : memref<5xf32, #tpu.memory_space<smem>>
    %c3 = arith.constant 3 : index
    %3 = memref.load %arg0[%c3] : memref<5xf32, #tpu.memory_space<smem>>
    %c4 = arith.constant 4 : index
    %4 = memref.load %arg0[%c4] : memref<5xf32, #tpu.memory_space<smem>>
    %c0_0 = arith.constant 0 : index
    %c0_1 = arith.constant 0 : index
    %5 = vector.load %arg2[%c0_0, %c0_1] : memref<2x2xf32, #tpu.memory_space<vmem>>, vector<1x2xf32>
    %c1_2 = arith.constant 1 : index
    %c0_3 = arith.constant 0 : index
    %6 = vector.load %arg2[%c1_2, %c0_3] : memref<2x2xf32, #tpu.memory_space<vmem>>, vector<1x2xf32>
    %c0_4 = arith.constant 0 : index
    %c0_5 = arith.constant 0 : index
    %7 = vector.load %arg3[%c0_4, %c0_5] : memref<2x32xf32, #tpu.memory_space<vmem>>, vector<1x32xf32>
    %c1_6 = arith.constant 1 : index
    %c0_7 = arith.constant 0 : index
    %8 = vector.load %arg3[%c1_6, %c0_7] : memref<2x32xf32, #tpu.memory_space<vmem>>, vector<1x32xf32>
    %c0_8 = arith.constant 0 : index
    %c0_9 = arith.constant 0 : index
    %9 = vector.load %arg5[%c0_8, %c0_9] : memref<1x2xf32, #tpu.memory_space<vmem>>, vector<1x2xf32>
    %c0_10 = arith.constant 0 : index
    %c0_11 = arith.constant 0 : index
    %10 = vector.load %arg8[%c0_10, %c0_11] : memref<1x32xf32, #tpu.memory_space<vmem>>, vector<1x32xf32>
    %c0_12 = arith.constant 0 : index
    %c0_13 = arith.constant 0 : index
    %11 = vector.load %arg1[%c0_12, %c0_13] : memref<8x1xf32, #tpu.memory_space<vmem>>, vector<8x1xf32>
    %c0_14 = arith.constant 0 : index
    %c0_15 = arith.constant 0 : index
    %12 = vector.load %arg4[%c0_14, %c0_15] : memref<1x2xf32, #tpu.memory_space<vmem>>, vector<1x2xf32>
    %13 = vector.broadcast %11 : vector<8x1xf32> to vector<8x2xf32>
    %14 = vector.broadcast %12 : vector<1x2xf32> to vector<8x2xf32>
    %15 = arith.mulf %13, %14 : vector<8x2xf32>
    %c0_16 = arith.constant 0 : index
    %c0_17 = arith.constant 0 : index
    %16 = vector.load %arg10[%c0_16, %c0_17] : memref<8x2xf32, #tpu.memory_space<vmem>>, vector<8x2xf32>
    tpu.vector_store %arg10[%c0_16, %c0_17], %15 {strides = array<i32>} : memref<8x2xf32, #tpu.memory_space<vmem>>, vector<8x2xf32>,
    %c0_18 = arith.constant 0 : index
    %c0_19 = arith.constant 0 : index
    %17 = vector.load %arg6[%c0_18, %c0_19] : memref<1x32xf32, #tpu.memory_space<vmem>>, vector<1x32xf32>
    %18 = vector.broadcast %11 : vector<8x1xf32> to vector<8x32xf32>
    %19 = vector.broadcast %17 : vector<1x32xf32> to vector<8x32xf32>
    %20 = arith.mulf %18, %19 : vector<8x32xf32>
    %c0_20 = arith.constant 0 : index
    %c0_21 = arith.constant 0 : index
    %21 = vector.load %arg7[%c0_20, %c0_21] : memref<1x32xf32, #tpu.memory_space<vmem>>, vector<1x32xf32>
    %22 = vector.broadcast %21 : vector<1x32xf32> to vector<8x32xf32>
    %23 = arith.addf %20, %22 : vector<8x32xf32>
    %c0_22 = arith.constant 0 : index
    %c0_23 = arith.constant 0 : index
    %24 = vector.load %arg11[%c0_22, %c0_23] : memref<8x32xf32, #tpu.memory_space<vmem>>, vector<8x32xf32>
    tpu.vector_store %arg11[%c0_22, %c0_23], %23 {strides = array<i32>} : memref<8x32xf32, #tpu.memory_space<vmem>>, vector<8x32xf32>,
    %cst = arith.constant 0.000000e+00 : f32
    %25 = vector.broadcast %cst : f32 to vector<1x2xf32>
    %c0_24 = arith.constant 0 : index
    %c0_25 = arith.constant 0 : index
    %26 = vector.load %arg10[%c0_24, %c0_25] : memref<8x2xf32, #tpu.memory_space<vmem>>, vector<8x2xf32>
    %c0_26 = arith.constant 0 : index
    %c0_27 = arith.constant 0 : index
    %27 = vector.load %arg11[%c0_26, %c0_27] : memref<8x32xf32, #tpu.memory_space<vmem>>, vector<8x32xf32>
    %28 = vector.extract_strided_slice %25 {offsets = [0, 0], sizes = [1, 1], strides = [1, 1]} : vector<1x2xf32> to vector<1x1xf32>
    %29 = vector.extract_strided_slice %25 {offsets = [0, 1], sizes = [1, 1], strides = [1, 1]} : vector<1x2xf32> to vector<1x1xf32>
    %30 = vector.extract_strided_slice %27 {offsets = [0, 0], sizes = [1, 32], strides = [1, 1]} : vector<8x32xf32> to vector<1x32xf32>
    %31 = vector.extract_strided_slice %26 {offsets = [0, 0], sizes = [1, 2], strides = [1, 1]} : vector<8x2xf32> to vector<1x2xf32>
    %32 = vector.broadcast %28 : vector<1x1xf32> to vector<1x32xf32>
    %33 = arith.mulf %32, %7 : vector<1x32xf32>
    %34 = arith.addf %30, %33 : vector<1x32xf32>
    %35 = vector.broadcast %28 : vector<1x1xf32> to vector<1x2xf32>
    %36 = arith.mulf %35, %5 : vector<1x2xf32>
    %37 = arith.addf %31, %36 : vector<1x2xf32>
    %38 = vector.broadcast %29 : vector<1x1xf32> to vector<1x32xf32>
    %39 = arith.mulf %38, %8 : vector<1x32xf32>
    %40 = arith.addf %34, %39 : vector<1x32xf32>
    %41 = vector.broadcast %29 : vector<1x1xf32> to vector<1x2xf32>
    %42 = arith.mulf %41, %6 : vector<1x2xf32>
    %43 = arith.addf %37, %42 : vector<1x2xf32>
    %cst_28 = arith.constant 0.000000e+00 : f32
    %44 = vector.broadcast %cst_28 : f32 to vector<1x32xf32>
    %45 = arith.maximumf %40, %44 : vector<1x32xf32>
    %46 = arith.mulf %45, %10 : vector<1x32xf32>
    %cst_29 = arith.constant dense<0.000000e+00> : vector<1xf32>
    %47 = vector.multi_reduction <add>, %46, %cst_29 [1] : vector<1x32xf32> to vector<1xf32>
    %48 = vector.shape_cast %47 : vector<1xf32> to vector<1x1xf32>
    %49 = vector.broadcast %2 : f32 to vector<1x1xf32>
    %50 = arith.addf %48, %49 : vector<1x1xf32>
    %51 = vector.broadcast %50 : vector<1x1xf32> to vector<1x2xf32>
    %52 = arith.mulf %51, %9 : vector<1x2xf32>
    %53 = arith.addf %43, %52 : vector<1x2xf32>
    %54 = vector.extract_strided_slice %53 {offsets = [0, 0], sizes = [1, 1], strides = [1, 1]} : vector<1x2xf32> to vector<1x1xf32>
    %55 = vector.extract_strided_slice %53 {offsets = [0, 1], sizes = [1, 1], strides = [1, 1]} : vector<1x2xf32> to vector<1x1xf32>
    %56 = vector.extract_strided_slice %27 {offsets = [1, 0], sizes = [1, 32], strides = [1, 1]} : vector<8x32xf32> to vector<1x32xf32>
    %57 = vector.extract_strided_slice %26 {offsets = [1, 0], sizes = [1, 2], strides = [1, 1]} : vector<8x2xf32> to vector<1x2xf32>
    %58 = vector.broadcast %54 : vector<1x1xf32> to vector<1x32xf32>
    %59 = arith.mulf %58, %7 : vector<1x32xf32>
    %60 = arith.addf %56, %59 : vector<1x32xf32>
    %61 = vector.broadcast %54 : vector<1x1xf32> to vector<1x2xf32>
    %62 = arith.mulf %61, %5 : vector<1x2xf32>
    %63 = arith.addf %57, %62 : vector<1x2xf32>
    %64 = vector.broadcast %55 : vector<1x1xf32> to vector<1x32xf32>
    %65 = arith.mulf %64, %8 : vector<1x32xf32>
    %66 = arith.addf %60, %65 : vector<1x32xf32>
    %67 = vector.broadcast %55 : vector<1x1xf32> to vector<1x2xf32>
    %68 = arith.mulf %67, %6 : vector<1x2xf32>
    %69 = arith.addf %63, %68 : vector<1x2xf32>
    %cst_30 = arith.constant 0.000000e+00 : f32
    %70 = vector.broadcast %cst_30 : f32 to vector<1x32xf32>
    %71 = arith.maximumf %66, %70 : vector<1x32xf32>
    %72 = arith.mulf %71, %10 : vector<1x32xf32>
    %cst_31 = arith.constant dense<0.000000e+00> : vector<1xf32>
    %73 = vector.multi_reduction <add>, %72, %cst_31 [1] : vector<1x32xf32> to vector<1xf32>
    %74 = vector.shape_cast %73 : vector<1xf32> to vector<1x1xf32>
    %75 = vector.broadcast %2 : f32 to vector<1x1xf32>
    %76 = arith.addf %74, %75 : vector<1x1xf32>
    %77 = vector.broadcast %76 : vector<1x1xf32> to vector<1x2xf32>
    %78 = arith.mulf %77, %9 : vector<1x2xf32>
    %79 = arith.addf %69, %78 : vector<1x2xf32>
    %80 = vector.extract_strided_slice %79 {offsets = [0, 0], sizes = [1, 1], strides = [1, 1]} : vector<1x2xf32> to vector<1x1xf32>
    %81 = vector.extract_strided_slice %79 {offsets = [0, 1], sizes = [1, 1], strides = [1, 1]} : vector<1x2xf32> to vector<1x1xf32>
    %82 = vector.extract_strided_slice %27 {offsets = [2, 0], sizes = [1, 32], strides = [1, 1]} : vector<8x32xf32> to vector<1x32xf32>
    %83 = vector.extract_strided_slice %26 {offsets = [2, 0], sizes = [1, 2], strides = [1, 1]} : vector<8x2xf32> to vector<1x2xf32>
    %84 = vector.broadcast %80 : vector<1x1xf32> to vector<1x32xf32>
    %85 = arith.mulf %84, %7 : vector<1x32xf32>
    %86 = arith.addf %82, %85 : vector<1x32xf32>
    %87 = vector.broadcast %80 : vector<1x1xf32> to vector<1x2xf32>
    %88 = arith.mulf %87, %5 : vector<1x2xf32>
    %89 = arith.addf %83, %88 : vector<1x2xf32>
    %90 = vector.broadcast %81 : vector<1x1xf32> to vector<1x32xf32>
    %91 = arith.mulf %90, %8 : vector<1x32xf32>
    %92 = arith.addf %86, %91 : vector<1x32xf32>
    %93 = vector.broadcast %81 : vector<1x1xf32> to vector<1x2xf32>
    %94 = arith.mulf %93, %6 : vector<1x2xf32>
    %95 = arith.addf %89, %94 : vector<1x2xf32>
    %cst_32 = arith.constant 0.000000e+00 : f32
    %96 = vector.broadcast %cst_32 : f32 to vector<1x32xf32>
    %97 = arith.maximumf %92, %96 : vector<1x32xf32>
    %98 = arith.mulf %97, %10 : vector<1x32xf32>
    %cst_33 = arith.constant dense<0.000000e+00> : vector<1xf32>
    %99 = vector.multi_reduction <add>, %98, %cst_33 [1] : vector<1x32xf32> to vector<1xf32>
    %100 = vector.shape_cast %99 : vector<1xf32> to vector<1x1xf32>
    %101 = vector.broadcast %2 : f32 to vector<1x1xf32>
    %102 = arith.addf %100, %101 : vector<1x1xf32>
    %103 = vector.broadcast %102 : vector<1x1xf32> to vector<1x2xf32>
    %104 = arith.mulf %103, %9 : vector<1x2xf32>
    %105 = arith.addf %95, %104 : vector<1x2xf32>
    %106 = vector.extract_strided_slice %105 {offsets = [0, 0], sizes = [1, 1], strides = [1, 1]} : vector<1x2xf32> to vector<1x1xf32>
    %107 = vector.extract_strided_slice %105 {offsets = [0, 1], sizes = [1, 1], strides = [1, 1]} : vector<1x2xf32> to vector<1x1xf32>
    %108 = vector.extract_strided_slice %27 {offsets = [3, 0], sizes = [1, 32], strides = [1, 1]} : vector<8x32xf32> to vector<1x32xf32>
    %109 = vector.extract_strided_slice %26 {offsets = [3, 0], sizes = [1, 2], strides = [1, 1]} : vector<8x2xf32> to vector<1x2xf32>
    %110 = vector.broadcast %106 : vector<1x1xf32> to vector<1x32xf32>
    %111 = arith.mulf %110, %7 : vector<1x32xf32>
    %112 = arith.addf %108, %111 : vector<1x32xf32>
    %113 = vector.broadcast %106 : vector<1x1xf32> to vector<1x2xf32>
    %114 = arith.mulf %113, %5 : vector<1x2xf32>
    %115 = arith.addf %109, %114 : vector<1x2xf32>
    %116 = vector.broadcast %107 : vector<1x1xf32> to vector<1x32xf32>
    %117 = arith.mulf %116, %8 : vector<1x32xf32>
    %118 = arith.addf %112, %117 : vector<1x32xf32>
    %119 = vector.broadcast %107 : vector<1x1xf32> to vector<1x2xf32>
    %120 = arith.mulf %119, %6 : vector<1x2xf32>
    %121 = arith.addf %115, %120 : vector<1x2xf32>
    %cst_34 = arith.constant 0.000000e+00 : f32
    %122 = vector.broadcast %cst_34 : f32 to vector<1x32xf32>
    %123 = arith.maximumf %118, %122 : vector<1x32xf32>
    %124 = arith.mulf %123, %10 : vector<1x32xf32>
    %cst_35 = arith.constant dense<0.000000e+00> : vector<1xf32>
    %125 = vector.multi_reduction <add>, %124, %cst_35 [1] : vector<1x32xf32> to vector<1xf32>
    %126 = vector.shape_cast %125 : vector<1xf32> to vector<1x1xf32>
    %127 = vector.broadcast %2 : f32 to vector<1x1xf32>
    %128 = arith.addf %126, %127 : vector<1x1xf32>
    %129 = vector.broadcast %128 : vector<1x1xf32> to vector<1x2xf32>
    %130 = arith.mulf %129, %9 : vector<1x2xf32>
    %131 = arith.addf %121, %130 : vector<1x2xf32>
    %132 = vector.extract_strided_slice %131 {offsets = [0, 0], sizes = [1, 1], strides = [1, 1]} : vector<1x2xf32> to vector<1x1xf32>
    %133 = vector.extract_strided_slice %131 {offsets = [0, 1], sizes = [1, 1], strides = [1, 1]} : vector<1x2xf32> to vector<1x1xf32>
    %134 = vector.extract_strided_slice %27 {offsets = [4, 0], sizes = [1, 32], strides = [1, 1]} : vector<8x32xf32> to vector<1x32xf32>
    %135 = vector.extract_strided_slice %26 {offsets = [4, 0], sizes = [1, 2], strides = [1, 1]} : vector<8x2xf32> to vector<1x2xf32>
    %136 = vector.broadcast %132 : vector<1x1xf32> to vector<1x32xf32>
    %137 = arith.mulf %136, %7 : vector<1x32xf32>
    %138 = arith.addf %134, %137 : vector<1x32xf32>
    %139 = vector.broadcast %132 : vector<1x1xf32> to vector<1x2xf32>
    %140 = arith.mulf %139, %5 : vector<1x2xf32>
    %141 = arith.addf %135, %140 : vector<1x2xf32>
    %142 = vector.broadcast %133 : vector<1x1xf32> to vector<1x32xf32>
    %143 = arith.mulf %142, %8 : vector<1x32xf32>
    %144 = arith.addf %138, %143 : vector<1x32xf32>
    %145 = vector.broadcast %133 : vector<1x1xf32> to vector<1x2xf32>
    %146 = arith.mulf %145, %6 : vector<1x2xf32>
    %147 = arith.addf %141, %146 : vector<1x2xf32>
    %cst_36 = arith.constant 0.000000e+00 : f32
    %148 = vector.broadcast %cst_36 : f32 to vector<1x32xf32>
    %149 = arith.maximumf %144, %148 : vector<1x32xf32>
    %150 = arith.mulf %149, %10 : vector<1x32xf32>
    %cst_37 = arith.constant dense<0.000000e+00> : vector<1xf32>
    %151 = vector.multi_reduction <add>, %150, %cst_37 [1] : vector<1x32xf32> to vector<1xf32>
    %152 = vector.shape_cast %151 : vector<1xf32> to vector<1x1xf32>
    %153 = vector.broadcast %2 : f32 to vector<1x1xf32>
    %154 = arith.addf %152, %153 : vector<1x1xf32>
    %155 = vector.broadcast %154 : vector<1x1xf32> to vector<1x2xf32>
    %156 = arith.mulf %155, %9 : vector<1x2xf32>
    %157 = arith.addf %147, %156 : vector<1x2xf32>
    %158 = vector.extract_strided_slice %157 {offsets = [0, 0], sizes = [1, 1], strides = [1, 1]} : vector<1x2xf32> to vector<1x1xf32>
    %159 = vector.extract_strided_slice %157 {offsets = [0, 1], sizes = [1, 1], strides = [1, 1]} : vector<1x2xf32> to vector<1x1xf32>
    %160 = vector.extract_strided_slice %27 {offsets = [5, 0], sizes = [1, 32], strides = [1, 1]} : vector<8x32xf32> to vector<1x32xf32>
    %161 = vector.extract_strided_slice %26 {offsets = [5, 0], sizes = [1, 2], strides = [1, 1]} : vector<8x2xf32> to vector<1x2xf32>
    %162 = vector.broadcast %158 : vector<1x1xf32> to vector<1x32xf32>
    %163 = arith.mulf %162, %7 : vector<1x32xf32>
    %164 = arith.addf %160, %163 : vector<1x32xf32>
    %165 = vector.broadcast %158 : vector<1x1xf32> to vector<1x2xf32>
    %166 = arith.mulf %165, %5 : vector<1x2xf32>
    %167 = arith.addf %161, %166 : vector<1x2xf32>
    %168 = vector.broadcast %159 : vector<1x1xf32> to vector<1x32xf32>
    %169 = arith.mulf %168, %8 : vector<1x32xf32>
    %170 = arith.addf %164, %169 : vector<1x32xf32>
    %171 = vector.broadcast %159 : vector<1x1xf32> to vector<1x2xf32>
    %172 = arith.mulf %171, %6 : vector<1x2xf32>
    %173 = arith.addf %167, %172 : vector<1x2xf32>
    %cst_38 = arith.constant 0.000000e+00 : f32
    %174 = vector.broadcast %cst_38 : f32 to vector<1x32xf32>
    %175 = arith.maximumf %170, %174 : vector<1x32xf32>
    %176 = arith.mulf %175, %10 : vector<1x32xf32>
    %cst_39 = arith.constant dense<0.000000e+00> : vector<1xf32>
    %177 = vector.multi_reduction <add>, %176, %cst_39 [1] : vector<1x32xf32> to vector<1xf32>
    %178 = vector.shape_cast %177 : vector<1xf32> to vector<1x1xf32>
    %179 = vector.broadcast %2 : f32 to vector<1x1xf32>
    %180 = arith.addf %178, %179 : vector<1x1xf32>
    %181 = vector.broadcast %180 : vector<1x1xf32> to vector<1x2xf32>
    %182 = arith.mulf %181, %9 : vector<1x2xf32>
    %183 = arith.addf %173, %182 : vector<1x2xf32>
    %184 = vector.extract_strided_slice %183 {offsets = [0, 0], sizes = [1, 1], strides = [1, 1]} : vector<1x2xf32> to vector<1x1xf32>
    %185 = vector.extract_strided_slice %183 {offsets = [0, 1], sizes = [1, 1], strides = [1, 1]} : vector<1x2xf32> to vector<1x1xf32>
    %186 = vector.extract_strided_slice %27 {offsets = [6, 0], sizes = [1, 32], strides = [1, 1]} : vector<8x32xf32> to vector<1x32xf32>
    %187 = vector.extract_strided_slice %26 {offsets = [6, 0], sizes = [1, 2], strides = [1, 1]} : vector<8x2xf32> to vector<1x2xf32>
    %188 = vector.broadcast %184 : vector<1x1xf32> to vector<1x32xf32>
    %189 = arith.mulf %188, %7 : vector<1x32xf32>
    %190 = arith.addf %186, %189 : vector<1x32xf32>
    %191 = vector.broadcast %184 : vector<1x1xf32> to vector<1x2xf32>
    %192 = arith.mulf %191, %5 : vector<1x2xf32>
    %193 = arith.addf %187, %192 : vector<1x2xf32>
    %194 = vector.broadcast %185 : vector<1x1xf32> to vector<1x32xf32>
    %195 = arith.mulf %194, %8 : vector<1x32xf32>
    %196 = arith.addf %190, %195 : vector<1x32xf32>
    %197 = vector.broadcast %185 : vector<1x1xf32> to vector<1x2xf32>
    %198 = arith.mulf %197, %6 : vector<1x2xf32>
    %199 = arith.addf %193, %198 : vector<1x2xf32>
    %cst_40 = arith.constant 0.000000e+00 : f32
    %200 = vector.broadcast %cst_40 : f32 to vector<1x32xf32>
    %201 = arith.maximumf %196, %200 : vector<1x32xf32>
    %202 = arith.mulf %201, %10 : vector<1x32xf32>
    %cst_41 = arith.constant dense<0.000000e+00> : vector<1xf32>
    %203 = vector.multi_reduction <add>, %202, %cst_41 [1] : vector<1x32xf32> to vector<1xf32>
    %204 = vector.shape_cast %203 : vector<1xf32> to vector<1x1xf32>
    %205 = vector.broadcast %2 : f32 to vector<1x1xf32>
    %206 = arith.addf %204, %205 : vector<1x1xf32>
    %207 = vector.broadcast %206 : vector<1x1xf32> to vector<1x2xf32>
    %208 = arith.mulf %207, %9 : vector<1x2xf32>
    %209 = arith.addf %199, %208 : vector<1x2xf32>
    %210 = vector.extract_strided_slice %209 {offsets = [0, 0], sizes = [1, 1], strides = [1, 1]} : vector<1x2xf32> to vector<1x1xf32>
    %211 = vector.extract_strided_slice %209 {offsets = [0, 1], sizes = [1, 1], strides = [1, 1]} : vector<1x2xf32> to vector<1x1xf32>
    %212 = vector.extract_strided_slice %27 {offsets = [7, 0], sizes = [1, 32], strides = [1, 1]} : vector<8x32xf32> to vector<1x32xf32>
    %213 = vector.broadcast %210 : vector<1x1xf32> to vector<1x32xf32>
    %214 = arith.mulf %213, %7 : vector<1x32xf32>
    %215 = arith.addf %212, %214 : vector<1x32xf32>
    %216 = vector.broadcast %211 : vector<1x1xf32> to vector<1x32xf32>
    %217 = arith.mulf %216, %8 : vector<1x32xf32>
    %218 = arith.addf %215, %217 : vector<1x32xf32>
    %cst_42 = arith.constant 0.000000e+00 : f32
    %219 = vector.broadcast %cst_42 : f32 to vector<1x32xf32>
    %220 = arith.maximumf %218, %219 : vector<1x32xf32>
    %221 = arith.mulf %220, %10 : vector<1x32xf32>
    %cst_43 = arith.constant dense<0.000000e+00> : vector<1xf32>
    %222 = vector.multi_reduction <add>, %221, %cst_43 [1] : vector<1x32xf32> to vector<1xf32>
    %223 = vector.shape_cast %222 : vector<1xf32> to vector<1x1xf32>
    %224 = vector.broadcast %2 : f32 to vector<1x1xf32>
    %225 = arith.addf %223, %224 : vector<1x1xf32>
    %226 = tpu.concatenate %25, %53, %79, %105, %131, %157, %183, %209 in 0 : vector<1x2xf32>, vector<1x2xf32>, vector<1x2xf32>, vector<1x2xf32>, vector<1x2xf32>, vector<1x2xf32>, vector<1x2xf32>, vector<1x2xf32> -> vector<8x2xf32>
    %227 = tpu.concatenate %50, %76, %102, %128, %154, %180, %206, %225 in 0 : vector<1x1xf32>, vector<1x1xf32>, vector<1x1xf32>, vector<1x1xf32>, vector<1x1xf32>, vector<1x1xf32>, vector<1x1xf32>, vector<1x1xf32> -> vector<8x1xf32>
    %c0_44 = arith.constant 0 : index
    %c0_45 = arith.constant 0 : index
    %228 = vector.load %arg1[%c0_44, %c0_45] : memref<8x1xf32, #tpu.memory_space<vmem>>, vector<8x1xf32>
    %229 = vector.broadcast %0 : f32 to vector<8x1xf32>
    %230 = arith.mulf %228, %229 : vector<8x1xf32>
    %231 = vector.broadcast %1 : f32 to vector<8x1xf32>
    %232 = arith.mulf %227, %231 : vector<8x1xf32>
    %233 = arith.addf %230, %232 : vector<8x1xf32>
    %234 = vector.extract_strided_slice %226 {offsets = [0, 0], sizes = [8, 1], strides = [1, 1]} : vector<8x2xf32> to vector<8x1xf32>
    %235 = vector.broadcast %3 : f32 to vector<8x1xf32>
    %236 = arith.mulf %234, %235 : vector<8x1xf32>
    %237 = arith.addf %233, %236 : vector<8x1xf32>
    %238 = vector.extract_strided_slice %226 {offsets = [0, 1], sizes = [8, 1], strides = [1, 1]} : vector<8x2xf32> to vector<8x1xf32>
    %239 = vector.broadcast %4 : f32 to vector<8x1xf32>
    %240 = arith.mulf %238, %239 : vector<8x1xf32>
    %241 = arith.addf %237, %240 : vector<8x1xf32>
    %c0_46 = arith.constant 0 : index
    %c0_47 = arith.constant 0 : index
    %242 = vector.load %arg9[%c0_46, %c0_47] : memref<8x1xf32, #tpu.memory_space<vmem>>, vector<8x1xf32>
    tpu.vector_store %arg9[%c0_46, %c0_47], %241 {strides = array<i32>} : memref<8x1xf32, #tpu.memory_space<vmem>>, vector<8x1xf32>,
    return
  }
}

</mosaic_0001>

<bundles_post_ra>
// kernel: tpu_custom_call.1
= control target key start
LH: loop header
LB: loop body
LE: loop exit
PB: predicated region body
PF: predicated region fallthrough
CT: control target
= control target key end

     0   :  { %14 = vsyncpa [#allocation5], 0  ;;  %s721_s0 = inlined_call_operand.vmem [shape: f32[5], index: 0, kind: input, shape index: {}]   ;;  %s722_s1 = inlined_call_operand.vmem [shape: f32[8,1], index: 1, kind: input, shape index: {}]   ;;  %s723_s2 = inlined_call_operand.vmem [shape: f32[2,2], index: 2, kind: input, shape index: {}]   ;;  %s724_s3 = inlined_call_operand.vmem [shape: f32[2,32], index: 3, kind: input, shape index: {}]   ;;  %s725_s4 = inlined_call_operand.vmem [shape: f32[1,2], index: 4, kind: input, shape index: {}]   ;;  %s726_s5 = inlined_call_operand.vmem [shape: f32[1,2], index: 5, kind: input, shape index: {}]   ;;  %s727_s6 = inlined_call_operand.vmem [shape: f32[1,32], index: 6, kind: input, shape index: {}]   ;;  %s728_s7 = inlined_call_operand.vmem [shape: f32[1,32], index: 7, kind: input, shape index: {}]   ;;  %s729_s8 = inlined_call_operand.vmem [shape: f32[1,32], index: 8, kind: input, shape index: {}]   ;;  %s730_s9 = inlined_call_operand.vmem [shape: f32[8,1], index: 9, kind: output, shape index: {}]  }
   0x1   :  { %s21_s11 = sshll.u32 %s721_s0, 4  ;;  %s22_s11 = int_to_ptr.vmem [resolvable:$true] %s21_s11 }
   0x2   :  { %s502_s12 = scalar_lea.vmem %s22_s11, 16  ;;  %p507_p1 = scmp.lt.s32.totalorder %s22_s11, %s22_s11 }
   0x3   :  { %p503_p0 = scmp.ne.s32.totalorder %s22_s11, %s502_s12  ;;  %p508_p2 = scmp.lt.s32.totalorder %s502_s12, %s502_s12 }
   0x5   :  { %p509_p3 = por %p508_p2, %p507_p1 }
   0x7   :  { %p510_p4 = pnand %p509_p3, %p503_p0 }
   0x9   :  { %513 = shalt.err (!%p510_p4)
}
   0xa   :  { %s516_s13 = smov [#allocation4]  }
   0xb   :  { %24 = dma.vmem_to_smem %s22_s11, 16, %s516_s13, [#allocation5]  }
   0xc   :  { %514 = dma.done.wait [#allocation5], 16  }
   0xd   :  { %515 = vsyncadd [#allocation5], 4294967280 }
   0xe   :  { %44 = sfence }
   0xf   :  { %v576_v0 = vld [vmem:[%s722_s1] sm:$0xff]  ;;  %v517_v1 = vmov 0   ;;  %vm70_vm0 = vcmask 15360   ;;  %vm88_vm1 = vcmask 261120   ;;  %vm102_vm2 = vcmask 253952   ;;  %s45_s28 = sld [smem:[#allocation4]] }
  0x10   :  { %493 = vset.pattern.permute.xlu0 %v517_v1  ;;  %494 = vset.pattern.permute.xlu1 %v517_v1  ;;  %v486_v2 = vld [vmem:[%s725_s4] ss:$0 sm:$0xff]  ;;  %v598_v10 = vld [vmem:[%s724_s3 + $0x1] sm:$0x1]  ;;  %v518_v33 = vmov 1   ;;  %v141_v34 = vlaneseq  ;;  %vm147_vm3 = vcmask 254977  }
  0x11   :  { %60 = vperm.xlu0 %493, %v576_v0   ;;  %v487_v3 = vld [vmem:[%s727_s6] ss:$0 sm:$0xff]  ;;  %v96_v12 = vmul.f32 0.0, %v598_v10  ;;  %v617_v22 = vld [vmem:[%s723_s2 + $0x1] sm:$0x1]  ;;  %vm438_vm4 = vcmask 1040384  }
  0x12   :  { %v488_v4 = vld [vmem:[%s728_s7] ss:$0 sm:$0xff]  ;;  %v98_v26 = vmul.f32 0.0, %v617_v22  ;;  %v142_v37 = vshrl.u32 %v141_v34, 7  ;;  %vm440_vm5 = vcmask 1041408   ;;  %vm203_vm6 = vcmask 256002  }
  0x13   :  { %v593_v9 = vld [vmem:[%s724_s3] sm:$0x1]  ;;  %s483_s3 = sld [smem:[#allocation4 + $0x2]]  ;;  %vm442_vm7 = vcmask 1042432   ;;  %vm249_vm8 = vcmask 257027   ;;  %vm444_vm9 = vcmask 1043456  }
  0x14   :  { %v92_v11 = vmul.f32 0.0, %v593_v9  ;;  %v55_v16 = vld [vmem:[%s729_s8] sm:$0x1]  ;;  %v143_v40 = vsub.s32 0, %v142_v37  ;;  %vm295_vm10 = vcmask 258052   ;;  %vm446_vm11 = vcmask 1044480  }
  0x15   :  { %v611_v20 = vld [vmem:[%s723_s2] sm:$0x1]  ;;  %vm341_vm12 = vcmask 259077   ;;  %vm448_vm13 = vcmask 1045504   ;;  %vm387_vm14 = vcmask 260102   ;;  %s485_s2 = sld [smem:[#allocation4 + $0x4]] }
  0x16   :  { %v94_v21 = vmul.f32 0.0, %v611_v20  ;;  %v54_v27 = vld [vmem:[%s726_s5] sm:$0x1]  ;;  %v636_v44 = vrot.slane %v55_v16, %v143_v40  ;;  %vm450_vm15 = vcmask 1046528   ;;  %s519_s5 = smov 127   ;;  %s482_s29 = sld [smem:[#allocation4 + $0x1]] }
  0x17   :  { %v641_v52 = vrot.slane %v54_v27, %v143_v40  ;;  %v215_v40 = vrot.slane %v593_v9, 6  ;;  %s484_s30 = sld [smem:[#allocation4 + $0x3]] }
  0x19   :  { %v621_v24 = vstv %s483_s3 }
  0x8c   :  { %v61_v5 = vpop.permute.xlu0 %60 }
  0x8d   :  { %v69_v6 = vmul.f32 %v486_v2, %v61_v5  ;;  %v79_v7 = vmul.f32 %v487_v3, %v61_v5  ;;  %v186_v2 = vrot.slane %v598_v10, 7  ;;  %v166_v3 = vrot.slane %v593_v9, 7 }
  0x8f   :  { %71 = vst.msk [vmem:[#allocation2] sm:$0xff] %vm70_vm0, %v69_v6  ;;  %v87_v8 = vadd.f32 %v488_v4, %v79_v7  ;;  %vm419_vm0 = vcmask 261127  }
  0x91   :  { %89 = vst.msk [vmem:[#allocation3] sm:$0xff] %vm88_vm1, %v87_v8  ;;  %vm475_vm1 = vcmask 7168  }
  0x96   :  { %v619_v23 = vld [vmem:[#allocation2] sm:$0xff] }
  0x97   :  { %v95_v25 = vadd.f32 %v94_v21, %v619_v23  ;;  %v194_v21 = vrot.slane %v617_v22, 7 }
  0x98   :  { %v602_v13 = vld [vmem:[#allocation3] sm:$0xff] }
  0x99   :  { %v93_v14 = vadd.f32 %v92_v11, %v602_v13  ;;  %v99_v31 = vadd.f32 %v98_v26, %v95_v25 }
  0x9b   :  { %v97_v15 = vadd.f32 %v96_v12, %v93_v14 }
  0x9d   :  { %v100_v17 = vmax.f32 %v97_v15, 0.0 }
  0x9f   :  { %v101_v18 = vmul.f32 %v100_v17, %v55_v16 }
  0xa1   :  { %v103_v19 = vsel %vm102_vm2, %v101_v18, 0.0  ;;  %v174_v18 = vrot.slane %v611_v20, 7 }
  0xa2   :  { %104 = vadd.xlane.f32.xlu0 %v103_v19 }
 0x12b   :  { %v105_v28 = vpop.xlane.xlu0 %104 }
 0x12c   :  { %v629_v29 = vadd.f32 %v621_v24, %v105_v28 }
 0x12e   :  { %v108_v30 = vmul.f32 %v629_v29, %v54_v27 }
 0x130   :  { %v109_v32 = vadd.f32 %v108_v30, %v99_v31 }
 0x132   :  { %112 = vperm.xlu1 %494, %v109_v32   ;;  %v424_v59 = vrot.slane %v109_v32, 7 }
 0x134   :  { %v439_v62 = vsel %vm438_vm4, 0.0, %v424_v59 }
 0x136   :  { %495 = vset.pattern.permute.xlu1 %v518_v33 }
 0x137   :  { %126 = vperm.xlu1 %495, %v109_v32  }
 0x1ad   :  { %v113_v35 = vpop.permute.xlu1 %112 }
 0x1ae   :  { %v115_v36 = vmul.f32 %v113_v35, %v593_v9  ;;  %v120_v49 = vmul.f32 %v113_v35, %v611_v20 }
 0x1b0   :  { %v117_v38 = vrot.slane %v115_v36, 7  ;;  %v122_v51 = vrot.slane %v120_v49, 7 }
 0x1b2   :  { %v127_v39 = vpop.permute.xlu1 %126  ;;  %v119_v42 = vadd.f32 %v117_v38, %v602_v13  ;;  %v124_v55 = vadd.f32 %v122_v51, %v619_v23 }
 0x1b3   :  { %v129_v41 = vmul.f32 %v127_v39, %v598_v10  ;;  %v134_v50 = vmul.f32 %v127_v39, %v617_v22 }
 0x1b5   :  { %v131_v43 = vrot.slane %v129_v41, 7  ;;  %v136_v53 = vrot.slane %v134_v50, 7 }
 0x1b7   :  { %v133_v45 = vadd.f32 %v131_v43, %v119_v42  ;;  %v138_v57 = vadd.f32 %v136_v53, %v124_v55  ;;  %v240_v55 = vrot.slane %v617_v22, 6 }
 0x1b9   :  { %v139_v46 = vmax.f32 %v133_v45, 0.0 }
 0x1bb   :  { %v146_v47 = vmul.f32 %v636_v44, %v139_v46 }
 0x1bd   :  { %v148_v48 = vsel %vm147_vm3, %v146_v47, 0.0 }
 0x1be   :  { %149 = vadd.xlane.f32.xlu1 %v148_v48 }
 0x247   :  { %v150_v54 = vpop.xlane.xlu1 %149 }
 0x248   :  { %v151_v56 = vadd.f32 %v150_v54, %v621_v24  ;;  %v222_v54 = vrot.slane %v611_v20, 6 }
 0x24a   :  { %v158_v58 = vmul.f32 %v641_v52, %v151_v56  ;;  %v452_v32 = vsel %vm438_vm4, %v629_v29, %v151_v56  ;;  %v233_v29 = vrot.slane %v598_v10, 6 }
 0x24c   :  { %v159_v60 = vadd.f32 %v158_v58, %v138_v57 }
 0x24e   :  { %182 = vperm.xlu1 %495, %v159_v60   ;;  %v426_v61 = vrot.slane %v159_v60, 7  ;;  %162 = vperm.xlu0 %493, %v159_v60  }
 0x250   :  { %v441_v63 = vsel %vm440_vm5, %v439_v62, %v426_v61 }
 0x252   :  { %496 = vset.pattern.permute.xlu1 %v517_v1 }
 0x2c9   :  { %v183_v4 = vpop.permute.xlu1 %182  ;;  %v163_v5 = vpop.permute.xlu0 %162 }
 0x2ca   :  { %v188_v6 = vmul.f32 %v186_v2, %v183_v4  ;;  %v168_v7 = vmul.f32 %v166_v3, %v163_v5  ;;  %v176_v19 = vmul.f32 %v174_v18, %v163_v5  ;;  %v196_v26 = vmul.f32 %v194_v21, %v183_v4 }
 0x2cc   :  { %v170_v8 = vrot.slane %v168_v7, 7  ;;  %v190_v11 = vrot.slane %v188_v6, 7  ;;  %v178_v25 = vrot.slane %v176_v19, 7  ;;  %v198_v30 = vrot.slane %v196_v26, 7 }
 0x2cd   :  { %v279_v7 = vrot.slane %v598_v10, 5 }
 0x2ce   :  { %v172_v12 = vadd.f32 %v170_v8, %v602_v13  ;;  %v180_v27 = vadd.f32 %v178_v25, %v619_v23  ;;  %v261_v8 = vrot.slane %v593_v9, 5 }
 0x2d0   :  { %v192_v14 = vadd.f32 %v190_v11, %v172_v12  ;;  %v200_v36 = vadd.f32 %v198_v30, %v180_v27  ;;  %v268_v27 = vrot.slane %v611_v20, 5  ;;  %v286_v30 = vrot.slane %v617_v22, 5 }
 0x2d2   :  { %v201_v15 = vmax.f32 %v192_v14, 0.0 }
 0x2d4   :  { %v202_v16 = vmul.f32 %v201_v15, %v636_v44 }
 0x2d6   :  { %v204_v17 = vsel %vm203_vm6, %v202_v16, 0.0 }
 0x2d7   :  { %205 = vadd.xlane.f32.xlu0 %v204_v17 }
 0x360   :  { %v206_v28 = vpop.xlane.xlu0 %205 }
 0x361   :  { %v207_v31 = vadd.f32 %v206_v28, %v621_v24 }
 0x363   :  { %v208_v34 = vmul.f32 %v207_v31, %v641_v52  ;;  %v453_v35 = vsel %vm440_vm5, %v452_v32, %v207_v31 }
 0x365   :  { %v209_v37 = vadd.f32 %v208_v34, %v200_v36 }
 0x367   :  { %212 = vperm.xlu1 %496, %v209_v37   ;;  %v428_v38 = vrot.slane %v209_v37, 7 }
 0x369   :  { %v443_v39 = vsel %vm442_vm7, %v441_v63, %v428_v38 }
 0x36b   :  { %497 = vset.pattern.permute.xlu1 %v518_v33 }
 0x36c   :  { %230 = vperm.xlu1 %497, %v209_v37  }
 0x3e2   :  { %v213_v41 = vpop.permute.xlu1 %212 }
 0x3e3   :  { %v217_v42 = vmul.f32 %v215_v40, %v213_v41  ;;  %v224_v56 = vmul.f32 %v222_v54, %v213_v41 }
 0x3e5   :  { %v219_v43 = vrot.slane %v217_v42, 7  ;;  %v226_v58 = vrot.slane %v224_v56, 7 }
 0x3e7   :  { %v231_v45 = vpop.permute.xlu1 %230  ;;  %v221_v47 = vadd.f32 %v219_v43, %v602_v13  ;;  %v228_v61 = vadd.f32 %v226_v58, %v619_v23  ;;  %v307_v43 = vrot.slane %v593_v9, 4  ;;  %v332_v58 = vrot.slane %v617_v22, 4 }
 0x3e8   :  { %v235_v46 = vmul.f32 %v233_v29, %v231_v45  ;;  %v242_v57 = vmul.f32 %v240_v55, %v231_v45 }
 0x3ea   :  { %v237_v48 = vrot.slane %v235_v46, 7  ;;  %v244_v59 = vrot.slane %v242_v57, 7 }
 0x3ec   :  { %v239_v49 = vadd.f32 %v237_v48, %v221_v47  ;;  %v246_v63 = vadd.f32 %v244_v59, %v228_v61  ;;  %v325_v47 = vrot.slane %v598_v10, 4 }
 0x3ee   :  { %v247_v50 = vmax.f32 %v239_v49, 0.0 }
 0x3f0   :  { %v248_v51 = vmul.f32 %v247_v50, %v636_v44 }
 0x3f2   :  { %v250_v53 = vsel %vm249_vm8, %v248_v51, 0.0 }
 0x3f3   :  { %251 = vadd.xlane.f32.xlu1 %v250_v53 }
 0x47c   :  { %v252_v60 = vpop.xlane.xlu1 %251 }
 0x47d   :  { %v253_v62 = vadd.f32 %v252_v60, %v621_v24 }
 0x47f   :  { %v254_v2 = vmul.f32 %v253_v62, %v641_v52  ;;  %v454_v3 = vsel %vm442_vm7, %v453_v35, %v253_v62 }
 0x481   :  { %v255_v4 = vadd.f32 %v254_v2, %v246_v63 }
 0x483   :  { %276 = vperm.xlu1 %497, %v255_v4   ;;  %v430_v5 = vrot.slane %v255_v4, 7  ;;  %258 = vperm.xlu0 %493, %v255_v4  }
 0x485   :  { %v445_v6 = vsel %vm444_vm9, %v443_v39, %v430_v5 }
 0x487   :  { %498 = vset.pattern.permute.xlu1 %v517_v1 }
 0x4fe   :  { %v277_v11 = vpop.permute.xlu1 %276  ;;  %v259_v12 = vpop.permute.xlu0 %258 }
 0x4ff   :  { %v281_v14 = vmul.f32 %v279_v7, %v277_v11  ;;  %v263_v15 = vmul.f32 %v261_v8, %v259_v12  ;;  %v270_v28 = vmul.f32 %v268_v27, %v259_v12  ;;  %v288_v32 = vmul.f32 %v286_v30, %v277_v11 }
 0x500   :  { %v353_v12 = vrot.slane %v593_v9, 3 }
 0x501   :  { %v265_v16 = vrot.slane %v263_v15, 7  ;;  %v283_v17 = vrot.slane %v281_v14, 7  ;;  %v272_v31 = vrot.slane %v270_v28, 7  ;;  %v290_v36 = vrot.slane %v288_v32, 7 }
 0x503   :  { %v267_v18 = vadd.f32 %v265_v16, %v602_v13  ;;  %v274_v34 = vadd.f32 %v272_v31, %v619_v23  ;;  %v371_v16 = vrot.slane %v598_v10, 3  ;;  %v378_v31 = vrot.slane %v617_v22, 3 }
 0x504   :  { %v468_v22 = vstv %s485_s2 }
 0x505   :  { %v285_v19 = vadd.f32 %v283_v17, %v267_v18  ;;  %v292_v40 = vadd.f32 %v290_v36, %v274_v34 }
 0x507   :  { %v293_v21 = vmax.f32 %v285_v19, 0.0 }
 0x509   :  { %v294_v25 = vmul.f32 %v293_v21, %v636_v44 }
 0x50b   :  { %v296_v26 = vsel %vm295_vm10, %v294_v25, 0.0 }
 0x50c   :  { %297 = vadd.xlane.f32.xlu0 %v296_v26 }
 0x595   :  { %v298_v35 = vpop.xlane.xlu0 %297 }
 0x596   :  { %v299_v37 = vadd.f32 %v298_v35, %v621_v24 }
 0x598   :  { %v300_v38 = vmul.f32 %v299_v37, %v641_v52  ;;  %v455_v39 = vsel %vm444_vm9, %v454_v3, %v299_v37 }
 0x59a   :  { %v301_v41 = vadd.f32 %v300_v38, %v292_v40 }
 0x59c   :  { %304 = vperm.xlu1 %498, %v301_v41   ;;  %v432_v42 = vrot.slane %v301_v41, 7 }
 0x59e   :  { %v447_v29 = vsel %vm446_vm11, %v445_v6, %v432_v42 }
 0x5a0   :  { %499 = vset.pattern.permute.xlu1 %v518_v33 }
 0x5a1   :  { %322 = vperm.xlu1 %499, %v301_v41  }
 0x5a5   :  { %501 = vset.pattern.permute.xlu1 %v517_v1  ;;  %v314_v1 = vrot.slane %v611_v20, 4 }
 0x617   :  { %v305_v45 = vpop.permute.xlu1 %304 }
 0x618   :  { %v309_v46 = vmul.f32 %v307_v43, %v305_v45  ;;  %v316_v59 = vmul.f32 %v314_v1, %v305_v45 }
 0x61a   :  { %v311_v48 = vrot.slane %v309_v46, 7  ;;  %v318_v61 = vrot.slane %v316_v59, 7  ;;  %v399_v46 = vrot.slane %v593_v9, 2 }
 0x61c   :  { %v323_v49 = vpop.permute.xlu1 %322  ;;  %v313_v51 = vadd.f32 %v311_v48, %v602_v13  ;;  %v320_v2 = vadd.f32 %v318_v61, %v619_v23 }
 0x61d   :  { %v327_v50 = vmul.f32 %v325_v47, %v323_v49  ;;  %v334_v60 = vmul.f32 %v332_v58, %v323_v49  ;;  %v462_v58 = vstv %s482_s29 }
 0x61f   :  { %v329_v53 = vrot.slane %v327_v50, 7  ;;  %v336_v62 = vrot.slane %v334_v60, 7  ;;  %v465_v60 = vstv %s484_s30 }
 0x621   :  { %v331_v54 = vadd.f32 %v329_v53, %v313_v51  ;;  %v338_v4 = vadd.f32 %v336_v62, %v320_v2 }
 0x623   :  { %v339_v55 = vmax.f32 %v331_v54, 0.0 }
 0x625   :  { %v340_v56 = vmul.f32 %v339_v55, %v636_v44 }
 0x627   :  { %v342_v57 = vsel %vm341_vm12, %v340_v56, 0.0 }
 0x628   :  { %343 = vadd.xlane.f32.xlu1 %v342_v57 }
 0x6b1   :  { %v344_v63 = vpop.xlane.xlu1 %343 }
 0x6b2   :  { %v345_v3 = vadd.f32 %v344_v63, %v621_v24 }
 0x6b4   :  { %v346_v5 = vmul.f32 %v345_v3, %v641_v52  ;;  %v456_v6 = vsel %vm446_vm11, %v455_v39, %v345_v3 }
 0x6b6   :  { %v347_v7 = vadd.f32 %v346_v5, %v338_v4 }
 0x6b8   :  { %350 = vperm.xlu0 %493, %v347_v7   ;;  %v434_v8 = vrot.slane %v347_v7, 7 }
 0x6ba   :  { %v449_v11 = vsel %vm448_vm13, %v447_v29, %v434_v8 }
 0x6bc   :  { %500 = vset.pattern.permute.xlu0 %v518_v33  ;;  %v360_v33 = vrot.slane %v611_v20, 3 }
 0x6bd   :  { %368 = vperm.xlu0 %500, %v347_v7  }
 0x733   :  { %v351_v14 = vpop.permute.xlu0 %350 }
 0x734   :  { %v355_v15 = vmul.f32 %v353_v12, %v351_v14  ;;  %v362_v32 = vmul.f32 %v360_v33, %v351_v14 }
 0x736   :  { %v357_v17 = vrot.slane %v355_v15, 7  ;;  %v364_v35 = vrot.slane %v362_v32, 7 }
 0x738   :  { %v369_v18 = vpop.permute.xlu0 %368  ;;  %v359_v21 = vadd.f32 %v357_v17, %v602_v13  ;;  %v366_v38 = vadd.f32 %v364_v35, %v619_v23  ;;  %v410_v23 = vrot.slane %v598_v10, 2  ;;  %v460_v10 = vstv %s45_s28 }
 0x739   :  { %v373_v19 = vmul.f32 %v371_v16, %v369_v18  ;;  %v380_v34 = vmul.f32 %v378_v31, %v369_v18  ;;  %v461_v59 = vmul.f32 %v460_v10, %v576_v0 }
 0x73b   :  { %v375_v25 = vrot.slane %v373_v19, 7  ;;  %v382_v36 = vrot.slane %v380_v34, 7 }
 0x73d   :  { %v377_v26 = vadd.f32 %v375_v25, %v359_v21  ;;  %v384_v40 = vadd.f32 %v382_v36, %v366_v38 }
 0x73f   :  { %v385_v27 = vmax.f32 %v377_v26, 0.0 }
 0x741   :  { %v386_v28 = vmul.f32 %v385_v27, %v636_v44 }
 0x743   :  { %v388_v30 = vsel %vm387_vm14, %v386_v28, 0.0 }
 0x744   :  { %389 = vadd.xlane.f32.xlu1 %v388_v30 }
 0x7cd   :  { %v390_v37 = vpop.xlane.xlu1 %389 }
 0x7ce   :  { %v391_v39 = vadd.f32 %v390_v37, %v621_v24 }
 0x7d0   :  { %v392_v41 = vmul.f32 %v391_v39, %v641_v52  ;;  %v457_v42 = vsel %vm448_vm13, %v456_v6, %v391_v39 }
 0x7d2   :  { %v393_v29 = vadd.f32 %v392_v41, %v384_v40 }
 0x7d4   :  { %407 = vperm.xlu0 %500, %v393_v29   ;;  %v436_v20 = vrot.slane %v393_v29, 7  ;;  %396 = vperm.xlu1 %501, %v393_v29  }
 0x7d6   :  { %v451_v43 = vsel %vm450_vm15, %v449_v11, %v436_v20 }
 0x7d7   :  { %v469_v45 = vmul.f32 %v468_v22, %v451_v43  ;;  %v466_v62 = vmul.f32 %v465_v60, %v451_v43 }
 0x7d9   :  { %471 = vrot.lane.b32.xlu1 %v469_v45, %s519_s5 }
 0x84f   :  { %v408_v47 = vpop.permute.xlu0 %407  ;;  %v397_v48 = vpop.permute.xlu1 %396 }
 0x850   :  { %v412_v52 = vmul.f32 %v410_v23, %v408_v47  ;;  %v401_v49 = vmul.f32 %v399_v46, %v397_v48 }
 0x852   :  { %v403_v50 = vrot.slane %v401_v49, 7  ;;  %v414_v51 = vrot.slane %v412_v52, 7 }
 0x854   :  { %v405_v53 = vadd.f32 %v403_v50, %v602_v13 }
 0x856   :  { %v416_v54 = vadd.f32 %v414_v51, %v405_v53 }
 0x858   :  { %v417_v55 = vmax.f32 %v416_v54, 0.0 }
 0x85a   :  { %v418_v56 = vmul.f32 %v417_v55, %v636_v44  ;;  %v472_v44 = vpop.permute.xlu1 %471 }
 0x85c   :  { %v420_v57 = vsel %vm419_vm0, %v418_v56, 0.0 }
 0x85d   :  { %421 = vadd.xlane.f32.xlu0 %v420_v57 }
 0x8e6   :  { %v422_v9 = vpop.xlane.xlu0 %421 }
 0x8e7   :  { %v423_v1 = vadd.f32 %v422_v9, %v621_v24 }
 0x8e9   :  { %v458_v13 = vsel %vm450_vm15, %v457_v42, %v423_v1 }
 0x8ea   :  { %v463_v61 = vmul.f32 %v462_v58, %v458_v13 }
 0x8ec   :  { %v464_v63 = vadd.f32 %v463_v61, %v461_v59 }
 0x8ee   :  { %v467_v2 = vadd.f32 %v466_v62, %v464_v63 }
 0x8f0   :  { %v474_v3 = vadd.f32 %v472_v44, %v467_v2 }
 0x8f2   :  { %476 = vst.msk [vmem:[%s730_s9] sm:$0xff] %vm475_vm1, %v474_v3 }
 0x8f3   :  { %481 = vsyncpa [#allocation5], 1 }

</bundles_post_ra>
